<compile_context>
chip_gen: v7x
topology: tpu7x:2x2x1
jax: 0.10.0
libtpu: 0.0.40
codegen_flags: <defaults>
</compile_context>

<pallas_src>
import functools

import jax
import jax.numpy as jnp
from jax import lax
from jax.experimental import pallas as pl
from jax.experimental.pallas import tpu as pltpu


def _round_up(x, m):
    return ((x + m - 1) // m) * m


def _self_attention_kernel(x_j_ref, x_i_ref, mqk_ref, aq_ref, wv_ref, bv_ref,
                           gamma_ref, out_ref, u_ref, m_ref, l_ref, acc_ref,
                           *, n_valid, tile_i, needs_mask):
    i = pl.program_id(2)
    n_i = pl.num_programs(2)

    # ---- per-(b, j) init: folded key/query projection u = (Wq^T Wk) x_j + Wq^T bk
    @pl.when(i == 0)
    def _():
        x_j = x_j_ref[0]                                             # (C, TJ) bf16
        u = jnp.dot(mqk_ref[...], x_j,
                    preferred_element_type=jnp.float32)              # (C, TJ) f32
        u_ref[...] = (u + aq_ref[...]).astype(jnp.bfloat16)
        m_ref[...] = jnp.full_like(m_ref, -1e30)
        l_ref[...] = jnp.zeros_like(l_ref)
        acc_ref[...] = jnp.zeros_like(acc_ref)

    x_i = x_i_ref[0]                                                 # (C, TI) bf16

    # scores s[p, q] = sum_c x_i[c, p] * u[c, q]  (contract dim 0 of both operands)
    s = lax.dot_general(x_i, u_ref[...], (((0,), (0,)), ((), ())),
                        preferred_element_type=jnp.float32)          # (TI, TJ) f32

    if needs_mask:  # static: only emitted when N was padded
        row = lax.broadcasted_iota(jnp.int32, (s.shape[0], 1), 0) + i * tile_i
        s = jnp.where(row < n_valid, s, -1e30)

    # ---- online softmax over the i axis (== softmax over dim=-2 of full s) ----
    m_prev = m_ref[...]                                              # (1, TJ)
    m_new = jnp.maximum(m_prev, jnp.max(s, axis=0, keepdims=True))   # (1, TJ)
    alpha = jnp.exp(m_prev - m_new)                                  # (1, TJ)
    p = jnp.exp(s - m_new)                                           # (TI, TJ) f32
    l_ref[...] = alpha * l_ref[...] + jnp.sum(p, axis=0, keepdims=True)

    # value projection for this i-tile (bf16 MXU, f32 accumulate)
    v_i = (jnp.dot(wv_ref[...], x_i, preferred_element_type=jnp.float32)
           + bv_ref[...]).astype(jnp.bfloat16)                       # (C, TI)
    acc_ref[...] = alpha * acc_ref[...] + jnp.dot(
        v_i, p.astype(jnp.bfloat16), preferred_element_type=jnp.float32)
    m_ref[...] = m_new

    # ---- finalize: normalize, scale by gamma, residual add --------------------
    @pl.when(i == n_i - 1)
    def _():
        inv_l = pl.reciprocal(l_ref[...], approx=True)               # (1, TJ)
        o = acc_ref[...] * inv_l                                     # (C, TJ) f32
        out_ref[0] = x_j_ref[0].astype(jnp.float32) + gamma_ref[0] * o


def self_attention_pallas(x_nchw, wq, bq, wk, bk, wv, bv, gamma, *, tile_n=512):
    B, C, H, W = x_nchw.shape
    N = H * W
    f32 = jnp.float32
    bf16 = jnp.bfloat16

    # Fold the query/key 1x1 convs so the score matmul contracts over C, not C//8.
    mqk = (wq.astype(f32).T @ wk.astype(f32)).astype(bf16)           # (C, C)
    aq = (wq.astype(f32).T @ bk.astype(f32)).reshape(C, 1)           # (C, 1) f32

    wv_b = wv.astype(bf16)                                           # (C, C)
    bv2 = bv.astype(f32).reshape(C, 1)
    gamma1 = gamma.astype(f32).reshape(1)

    # Lane-dense tiling of the flattened spatial axis (pad N to a tile multiple).
    if N >= tile_n:
        tn = tile_n
    else:
        tn = _round_up(N, 128)
    n_pad = _round_up(N, tn)
    needs_mask = n_pad != N

    x_flat = x_nchw.reshape(B, C, N).astype(bf16)
    if needs_mask:
        x_flat = jnp.pad(x_flat, ((0, 0), (0, 0), (0, n_pad - N)))

    n_tiles = n_pad // tn
    grid = (B, n_tiles, n_tiles)         # (batch, j-tiles, i-tiles[reduction])

    kernel = functools.partial(_self_attention_kernel,
                               n_valid=N, tile_i=tn, needs_mask=needs_mask)

    # Explicit VMEM budget derived from the chosen tiles (clamped for v7x's 64 MiB).
    est = (2 * 2 * C * tn * 2            # x_i / x_j blocks, double-buffered bf16
           + 2 * C * tn * 4              # out block, double-buffered f32
           + 2 * 2 * C * C * 2           # mqk, wv weights (double-buffered) bf16
           + 2 * 2 * C * 4               # aq, bv
           + C * tn * 2 + C * tn * 4     # u, acc scratch
           + 2 * tn * 4                  # running max / sum scratch
           + 3 * tn * tn * 4)            # s / p live intermediates
    vmem_limit = int(min(64 * 1024 * 1024, max(32 * 1024 * 1024, 2 * est)))

    out_flat = pl.pallas_call(
        kernel,
        out_shape=jax.ShapeDtypeStruct((B, C, n_pad), f32),
        grid=grid,
        in_specs=[
            pl.BlockSpec((1, C, tn), lambda b, j, i: (b, 0, j)),     # x  (j columns)
            pl.BlockSpec((1, C, tn), lambda b, j, i: (b, 0, i)),     # x  (i columns)
            pl.BlockSpec((C, C), lambda b, j, i: (0, 0)),            # Wq^T Wk
            pl.BlockSpec((C, 1), lambda b, j, i: (0, 0)),            # Wq^T bk
            pl.BlockSpec((C, C), lambda b, j, i: (0, 0)),            # Wv
            pl.BlockSpec((C, 1), lambda b, j, i: (0, 0)),            # bv
            pl.BlockSpec(memory_space=pltpu.MemorySpace.SMEM),       # gamma (scalar)
        ],
        out_specs=pl.BlockSpec((1, C, tn), lambda b, j, i: (b, 0, j)),
        scratch_shapes=[
            pltpu.VMEM((C, tn), bf16),        # u = Wq^T Wk x_j + Wq^T bk
            pltpu.VMEM((1, tn), f32),         # running max
            pltpu.VMEM((1, tn), f32),         # running sum
            pltpu.VMEM((C, tn), f32),         # output accumulator
        ],
        compiler_params=pltpu.CompilerParams(
            dimension_semantics=("parallel", "parallel", "arbitrary"),
            vmem_limit_bytes=vmem_limit),
    )(x_flat, x_flat, mqk, aq, wv_b, bv2, gamma1)

    return out_flat[:, :, :N].reshape(B, C, H, W)


def self_attention_ref(x, wq, bq, wk, bk, wv, bv, gamma):
    # pure-JAX f32 reference mirroring the PyTorch forward exactly
    B, C, H, W = x.shape
    N = H * W
    xf = x.reshape(B, C, N)
    q = jnp.einsum('oc,bcn->bon', wq, xf) + bq[None, :, None]       # (B, Cq, N)
    k = jnp.einsum('oc,bcn->bon', wk, xf) + bk[None, :, None]       # (B, Cq, N)
    v = jnp.einsum('oc,bcn->bon', wv, xf) + bv[None, :, None]       # (B, C,  N)
    s = jnp.einsum('bci,bcj->bij', q, k)                            # s[i,j] = q_i . k_j
    att = jax.nn.softmax(s, axis=-2)                                # softmax over dim=-2
    o = jnp.einsum('bci,bij->bcj', v, att)                          # (B, C, N)
    return x + gamma[0] * o.reshape(B, C, H, W)


if __name__ == "__main__":
    B, C, H, W = 2, 16, 8, 8          # input_nc must be >= 8 (conv to C//8 channels)
    Cq = C // 8

    key = jax.random.PRNGKey(0)
    kx, k1, k2, k3, k4, k5, k6, k7 = jax.random.split(key, 8)

    x = jax.random.normal(kx, (B, C, H, W), dtype=jnp.float32)

    # deterministic parameter init (shapes per nn.Conv2d 1x1 kernels, squeezed)
    wq = 0.1 * jax.random.normal(k1, (Cq, C), dtype=jnp.float32)
    bq = 0.1 * jax.random.normal(k2, (Cq,), dtype=jnp.float32)
    wk = 0.1 * jax.random.normal(k3, (Cq, C), dtype=jnp.float32)
    bk = 0.1 * jax.random.normal(k4, (Cq,), dtype=jnp.float32)
    wv = 0.1 * jax.random.normal(k5, (C, C), dtype=jnp.float32)
    bv = 0.1 * jax.random.normal(k6, (C,), dtype=jnp.float32)
    # nn.Parameter(torch.zeros(1)) in the module; nonzero here so the attention
    # path is actually exercised.
    gamma = 0.5 + 0.0 * jax.random.normal(k7, (1,), dtype=jnp.float32)

    out = self_attention_pallas(x, wq, bq, wk, bk, wv, bv, gamma)
    out = jax.block_until_ready(out)

    ref = self_attention_ref(x, wq, bq, wk, bk, wv, bv, gamma)
    assert out.shape == (B, C, H, W)
    # bf16 matmul operands + approx reciprocal -> bf16-level tolerance
    assert jnp.allclose(out, ref, atol=3e-2, rtol=3e-2), "mismatch vs reference"

    print("KERNEL_OK")
</pallas_src>

<mosaic_0001>
module attributes {stable_mosaic.version = 11 : i64} {
  func.func @_self_attention_kernel(%arg0: i32, %arg1: i32, %arg2: i32, %arg3: memref<1x16x128xbf16, #tpu.memory_space<vmem>>, %arg4: memref<1x16x128xbf16, #tpu.memory_space<vmem>>, %arg5: memref<16x16xbf16, #tpu.memory_space<vmem>>, %arg6: memref<16x1xf32, #tpu.memory_space<vmem>>, %arg7: memref<16x16xbf16, #tpu.memory_space<vmem>>, %arg8: memref<16x1xf32, #tpu.memory_space<vmem>>, %arg9: memref<1xf32, #tpu.memory_space<smem>>, %arg10: memref<1x16x128xf32, #tpu.memory_space<vmem>>, %arg11: memref<16x128xbf16, #tpu.memory_space<vmem>>, %arg12: memref<1x128xf32, #tpu.memory_space<vmem>>, %arg13: memref<1x128xf32, #tpu.memory_space<vmem>>, %arg14: memref<16x128xf32, #tpu.memory_space<vmem>>) attributes {dimension_semantics = [#tpu.dimension_semantics<parallel>, #tpu.dimension_semantics<parallel>, #tpu.dimension_semantics<arbitrary>], iteration_bounds = array<i64: 2, 1, 1>, scalar_prefetch = 0 : i64, scratch_operands = 4 : i64, tpu.core_type = #tpu.core_type<tc>, window_params = [{transform_indices = @transform_0, window_bounds = array<i64: 1, 16, 128>}, {transform_indices = @transform_1, window_bounds = array<i64: 1, 16, 128>}, {pipeline_mode = #tpu.pipeline_mode<synchronous>, transform_indices = @transform_2, window_bounds = array<i64: 16, 16>}, {pipeline_mode = #tpu.pipeline_mode<synchronous>, transform_indices = @transform_3, window_bounds = array<i64: 16, 1>}, {pipeline_mode = #tpu.pipeline_mode<synchronous>, transform_indices = @transform_4, window_bounds = array<i64: 16, 16>}, {pipeline_mode = #tpu.pipeline_mode<synchronous>, transform_indices = @transform_5, window_bounds = array<i64: 16, 1>}, {transform_indices = @transform_6, window_bounds = array<i64: 1>}, {transform_indices = @transform_7, window_bounds = array<i64: 1, 16, 128>}]} {
    %c0_i32 = arith.constant 0 : i32
    %0 = arith.cmpi eq, %arg2, %c0_i32 : i32
    %1 = arith.extui %0 : i1 to i32
    %c0_i32_0 = arith.constant 0 : i32
    %2 = arith.cmpi ne, %1, %c0_i32_0 : i32
    scf.if %2 {
      %c0_28 = arith.constant 0 : index
      %c0_29 = arith.constant 0 : index
      %c0_30 = arith.constant 0 : index
      %49 = vector.load %arg3[%c0_28, %c0_29, %c0_30] : memref<1x16x128xbf16, #tpu.memory_space<vmem>>, vector<1x16x128xbf16>
      %50 = vector.shape_cast %49 : vector<1x16x128xbf16> to vector<16x128xbf16>
      %c0_31 = arith.constant 0 : index
      %c0_32 = arith.constant 0 : index
      %51 = vector.load %arg5[%c0_31, %c0_32] : memref<16x16xbf16, #tpu.memory_space<vmem>>, vector<16x16xbf16>
      %cst_33 = arith.constant dense<0.000000e+00> : vector<16x128xf32>
      %52 = tpu.matmul %51, %50, %cst_33 {dimension_numbers = #tpu.dot_dimension_numbers<[1], [0], [0], [1], [0, 0, 1, 1], [], []>} : vector<16x16xbf16>, vector<16x128xbf16>, vector<16x128xf32> -> vector<16x128xf32>
      %c0_34 = arith.constant 0 : index
      %c0_35 = arith.constant 0 : index
      %53 = vector.load %arg6[%c0_34, %c0_35] : memref<16x1xf32, #tpu.memory_space<vmem>>, vector<16x1xf32>
      %54 = vector.broadcast %53 : vector<16x1xf32> to vector<16x128xf32>
      %55 = arith.addf %52, %54 : vector<16x128xf32>
      %56 = arith.truncf %55 : vector<16x128xf32> to vector<16x128xbf16>
      %c0_36 = arith.constant 0 : index
      %c0_37 = arith.constant 0 : index
      %57 = vector.load %arg11[%c0_36, %c0_37] : memref<16x128xbf16, #tpu.memory_space<vmem>>, vector<16x128xbf16>
      tpu.vector_store %arg11[%c0_36, %c0_37], %56 {strides = array<i32>} : memref<16x128xbf16, #tpu.memory_space<vmem>>, vector<16x128xbf16>,
      %cst_38 = arith.constant -1.000000e+30 : f32
      %58 = vector.broadcast %cst_38 : f32 to vector<1x128xf32>
      %c0_39 = arith.constant 0 : index
      %c0_40 = arith.constant 0 : index
      %59 = vector.load %arg12[%c0_39, %c0_40] : memref<1x128xf32, #tpu.memory_space<vmem>>, vector<1x128xf32>
      tpu.vector_store %arg12[%c0_39, %c0_40], %58 {strides = array<i32>} : memref<1x128xf32, #tpu.memory_space<vmem>>, vector<1x128xf32>,
      %cst_41 = arith.constant 0.000000e+00 : f32
      %60 = vector.broadcast %cst_41 : f32 to vector<1x128xf32>
      %c0_42 = arith.constant 0 : index
      %c0_43 = arith.constant 0 : index
      %61 = vector.load %arg13[%c0_42, %c0_43] : memref<1x128xf32, #tpu.memory_space<vmem>>, vector<1x128xf32>
      tpu.vector_store %arg13[%c0_42, %c0_43], %60 {strides = array<i32>} : memref<1x128xf32, #tpu.memory_space<vmem>>, vector<1x128xf32>,
      %cst_44 = arith.constant 0.000000e+00 : f32
      %62 = vector.broadcast %cst_44 : f32 to vector<16x128xf32>
      %c0_45 = arith.constant 0 : index
      %c0_46 = arith.constant 0 : index
      %63 = vector.load %arg14[%c0_45, %c0_46] : memref<16x128xf32, #tpu.memory_space<vmem>>, vector<16x128xf32>
      tpu.vector_store %arg14[%c0_45, %c0_46], %62 {strides = array<i32>} : memref<16x128xf32, #tpu.memory_space<vmem>>, vector<16x128xf32>,
    } else {
    }
    %c0 = arith.constant 0 : index
    %c0_1 = arith.constant 0 : index
    %c0_2 = arith.constant 0 : index
    %3 = vector.load %arg4[%c0, %c0_1, %c0_2] : memref<1x16x128xbf16, #tpu.memory_space<vmem>>, vector<1x16x128xbf16>
    %4 = vector.shape_cast %3 : vector<1x16x128xbf16> to vector<16x128xbf16>
    %c0_3 = arith.constant 0 : index
    %c0_4 = arith.constant 0 : index
    %5 = vector.load %arg11[%c0_3, %c0_4] : memref<16x128xbf16, #tpu.memory_space<vmem>>, vector<16x128xbf16>
    %cst = arith.constant dense<0.000000e+00> : vector<128x128xf32>
    %6 = tpu.matmul %4, %5, %cst {dimension_numbers = #tpu.dot_dimension_numbers<[0], [0], [1], [1], [0, 1, 1, 1], [], []>} : vector<16x128xbf16>, vector<16x128xbf16>, vector<128x128xf32> -> vector<128x128xf32>
    %7 = tpu.iota {dimensions = array<i32: 0>} : vector<128x1xi32>
    %c128_i32 = arith.constant 128 : i32
    %8 = arith.muli %arg2, %c128_i32 : i32
    %9 = vector.broadcast %8 : i32 to vector<128x1xi32>
    %10 = arith.addi %7, %9 : vector<128x1xi32>
    %c64_i32 = arith.constant 64 : i32
    %11 = vector.broadcast %c64_i32 : i32 to vector<128x1xi32>
    %12 = arith.cmpi slt, %10, %11 : vector<128x1xi32>
    %cst_5 = arith.constant -1.000000e+30 : f32
    %13 = vector.shape_cast %12 : vector<128x1xi1> to vector<128x1xi1>
    %14 = vector.broadcast %13 : vector<128x1xi1> to vector<128x128xi1>
    %15 = vector.broadcast %cst_5 : f32 to vector<128x128xf32>
    %16 = arith.select %14, %6, %15 : vector<128x128xi1>, vector<128x128xf32>
    %c0_6 = arith.constant 0 : index
    %c0_7 = arith.constant 0 : index
    %17 = vector.load %arg12[%c0_6, %c0_7] : memref<1x128xf32, #tpu.memory_space<vmem>>, vector<1x128xf32>
    %cst_8 = arith.constant dense<0xFF800000> : vector<128xf32>
    %18 = vector.multi_reduction <maximumf>, %16, %cst_8 [0] : vector<128x128xf32> to vector<128xf32>
    %19 = vector.shape_cast %18 : vector<128xf32> to vector<1x128xf32>
    %20 = arith.maximumf %17, %19 : vector<1x128xf32>
    %21 = arith.subf %17, %20 : vector<1x128xf32>
    %22 = math.exp %21 : vector<1x128xf32>
    %23 = vector.broadcast %20 : vector<1x128xf32> to vector<128x128xf32>
    %24 = arith.subf %16, %23 : vector<128x128xf32>
    %25 = math.exp %24 : vector<128x128xf32>
    %c0_9 = arith.constant 0 : index
    %c0_10 = arith.constant 0 : index
    %26 = vector.load %arg13[%c0_9, %c0_10] : memref<1x128xf32, #tpu.memory_space<vmem>>, vector<1x128xf32>
    %27 = arith.mulf %22, %26 : vector<1x128xf32>
    %cst_11 = arith.constant dense<0.000000e+00> : vector<128xf32>
    %28 = vector.multi_reduction <add>, %25, %cst_11 [0] : vector<128x128xf32> to vector<128xf32>
    %29 = vector.shape_cast %28 : vector<128xf32> to vector<1x128xf32>
    %30 = arith.addf %27, %29 : vector<1x128xf32>
    %c0_12 = arith.constant 0 : index
    %c0_13 = arith.constant 0 : index
    %31 = vector.load %arg13[%c0_12, %c0_13] : memref<1x128xf32, #tpu.memory_space<vmem>>, vector<1x128xf32>
    tpu.vector_store %arg13[%c0_12, %c0_13], %30 {strides = array<i32>} : memref<1x128xf32, #tpu.memory_space<vmem>>, vector<1x128xf32>,
    %c0_14 = arith.constant 0 : index
    %c0_15 = arith.constant 0 : index
    %32 = vector.load %arg7[%c0_14, %c0_15] : memref<16x16xbf16, #tpu.memory_space<vmem>>, vector<16x16xbf16>
    %cst_16 = arith.constant dense<0.000000e+00> : vector<16x128xf32>
    %33 = tpu.matmul %32, %4, %cst_16 {dimension_numbers = #tpu.dot_dimension_numbers<[1], [0], [0], [1], [0, 0, 1, 1], [], []>} : vector<16x16xbf16>, vector<16x128xbf16>, vector<16x128xf32> -> vector<16x128xf32>
    %c0_17 = arith.constant 0 : index
    %c0_18 = arith.constant 0 : index
    %34 = vector.load %arg8[%c0_17, %c0_18] : memref<16x1xf32, #tpu.memory_space<vmem>>, vector<16x1xf32>
    %35 = vector.broadcast %34 : vector<16x1xf32> to vector<16x128xf32>
    %36 = arith.addf %33, %35 : vector<16x128xf32>
    %37 = arith.truncf %36 : vector<16x128xf32> to vector<16x128xbf16>
    %c0_19 = arith.constant 0 : index
    %c0_20 = arith.constant 0 : index
    %38 = vector.load %arg14[%c0_19, %c0_20] : memref<16x128xf32, #tpu.memory_space<vmem>>, vector<16x128xf32>
    %39 = vector.broadcast %22 : vector<1x128xf32> to vector<16x128xf32>
    %40 = arith.mulf %39, %38 : vector<16x128xf32>
    %41 = arith.truncf %25 : vector<128x128xf32> to vector<128x128xbf16>
    %cst_21 = arith.constant dense<0.000000e+00> : vector<16x128xf32>
    %42 = tpu.matmul %37, %41, %cst_21 {dimension_numbers = #tpu.dot_dimension_numbers<[1], [0], [0], [1], [0, 0, 1, 1], [], []>} : vector<16x128xbf16>, vector<128x128xbf16>, vector<16x128xf32> -> vector<16x128xf32>
    %43 = arith.addf %40, %42 : vector<16x128xf32>
    %c0_22 = arith.constant 0 : index
    %c0_23 = arith.constant 0 : index
    %44 = vector.load %arg14[%c0_22, %c0_23] : memref<16x128xf32, #tpu.memory_space<vmem>>, vector<16x128xf32>
    tpu.vector_store %arg14[%c0_22, %c0_23], %43 {strides = array<i32>} : memref<16x128xf32, #tpu.memory_space<vmem>>, vector<16x128xf32>,
    %c0_24 = arith.constant 0 : index
    %c0_25 = arith.constant 0 : index
    %45 = vector.load %arg12[%c0_24, %c0_25] : memref<1x128xf32, #tpu.memory_space<vmem>>, vector<1x128xf32>
    tpu.vector_store %arg12[%c0_24, %c0_25], %20 {strides = array<i32>} : memref<1x128xf32, #tpu.memory_space<vmem>>, vector<1x128xf32>,
    %c0_i32_26 = arith.constant 0 : i32
    %46 = arith.cmpi eq, %arg2, %c0_i32_26 : i32
    %47 = arith.extui %46 : i1 to i32
    %c0_i32_27 = arith.constant 0 : i32
    %48 = arith.cmpi ne, %47, %c0_i32_27 : i32
    scf.if %48 {
      %c0_28 = arith.constant 0 : index
      %c0_29 = arith.constant 0 : index
      %49 = vector.load %arg13[%c0_28, %c0_29] : memref<1x128xf32, #tpu.memory_space<vmem>>, vector<1x128xf32>
      %50 = tpu.reciprocal %49 {approx = true} : vector<1x128xf32> -> vector<1x128xf32>
      %c0_30 = arith.constant 0 : index
      %c0_31 = arith.constant 0 : index
      %51 = vector.load %arg14[%c0_30, %c0_31] : memref<16x128xf32, #tpu.memory_space<vmem>>, vector<16x128xf32>
      %52 = vector.broadcast %50 : vector<1x128xf32> to vector<16x128xf32>
      %53 = arith.mulf %51, %52 : vector<16x128xf32>
      %c0_32 = arith.constant 0 : index
      %c0_33 = arith.constant 0 : index
      %c0_34 = arith.constant 0 : index
      %54 = vector.load %arg3[%c0_32, %c0_33, %c0_34] : memref<1x16x128xbf16, #tpu.memory_space<vmem>>, vector<1x16x128xbf16>
      %55 = vector.shape_cast %54 : vector<1x16x128xbf16> to vector<16x128xbf16>
      %56 = arith.extf %55 : vector<16x128xbf16> to vector<16x128xf32>
      %c0_35 = arith.constant 0 : index
      %57 = memref.load %arg9[%c0_35] : memref<1xf32, #tpu.memory_space<smem>>
      %58 = vector.broadcast %57 : f32 to vector<16x128xf32>
      %59 = arith.mulf %58, %53 : vector<16x128xf32>
      %60 = arith.addf %56, %59 : vector<16x128xf32>
      %c0_36 = arith.constant 0 : index
      %c0_37 = arith.constant 0 : index
      %c0_38 = arith.constant 0 : index
      %61 = vector.load %arg10[%c0_36, %c0_37, %c0_38] : memref<1x16x128xf32, #tpu.memory_space<vmem>>, vector<1x16x128xf32>
      %62 = vector.shape_cast %61 : vector<1x16x128xf32> to vector<16x128xf32>
      %63 = vector.shape_cast %60 : vector<16x128xf32> to vector<1x16x128xf32>
      tpu.vector_store %arg10[%c0_36, %c0_37, %c0_38], %63 {strides = array<i32>} : memref<1x16x128xf32, #tpu.memory_space<vmem>>, vector<1x16x128xf32>,
    } else {
    }
    return
  }
  func.func @transform_0(%arg0: i32, %arg1: i32, %arg2: i32) -> (i32, i32, i32) {
    %c0_i32 = arith.constant 0 : i32
    %c0_i32_0 = arith.constant 0 : i32
    return %arg0, %c0_i32, %arg1 : i32, i32, i32
  }
  func.func @transform_1(%arg0: i32, %arg1: i32, %arg2: i32) -> (i32, i32, i32) {
    %c0_i32 = arith.constant 0 : i32
    %c0_i32_0 = arith.constant 0 : i32
    return %arg0, %c0_i32, %arg2 : i32, i32, i32
  }
  func.func @transform_2(%arg0: i32, %arg1: i32, %arg2: i32) -> (i32, i32) {
    %c0_i32 = arith.constant 0 : i32
    %c0_i32_0 = arith.constant 0 : i32
    %c0_i32_1 = arith.constant 0 : i32
    return %c0_i32, %c0_i32_0 : i32, i32
  }
  func.func @transform_3(%arg0: i32, %arg1: i32, %arg2: i32) -> (i32, i32) {
    %c0_i32 = arith.constant 0 : i32
    %c0_i32_0 = arith.constant 0 : i32
    %c0_i32_1 = arith.constant 0 : i32
    return %c0_i32, %c0_i32_0 : i32, i32
  }
  func.func @transform_4(%arg0: i32, %arg1: i32, %arg2: i32) -> (i32, i32) {
    %c0_i32 = arith.constant 0 : i32
    %c0_i32_0 = arith.constant 0 : i32
    %c0_i32_1 = arith.constant 0 : i32
    return %c0_i32, %c0_i32_0 : i32, i32
  }
  func.func @transform_5(%arg0: i32, %arg1: i32, %arg2: i32) -> (i32, i32) {
    %c0_i32 = arith.constant 0 : i32
    %c0_i32_0 = arith.constant 0 : i32
    %c0_i32_1 = arith.constant 0 : i32
    return %c0_i32, %c0_i32_0 : i32, i32
  }
  func.func @transform_6(%arg0: i32, %arg1: i32, %arg2: i32) -> i32 {
    %c0_i32 = arith.constant 0 : i32
    %c0_i32_0 = arith.constant 0 : i32
    return %c0_i32 : i32
  }
  func.func @transform_7(%arg0: i32, %arg1: i32, %arg2: i32) -> (i32, i32, i32) {
    %c0_i32 = arith.constant 0 : i32
    %c0_i32_0 = arith.constant 0 : i32
    return %arg0, %c0_i32, %arg1 : i32, i32, i32
  }
}

</mosaic_0001>

<bundles_post_ra>
// kernel: tpu_custom_call.1
= control target key start
LH: loop header
LB: loop body
LE: loop exit
PB: predicated region body
PF: predicated region fallthrough
CT: control target
= control target key end

     0   :  { %s1561_s0 = inlined_call_operand.vmem [shape: bf16[2,16,128], index: 0, kind: input, shape index: {}]   ;;  %s1562_s1 = inlined_call_operand.vmem [shape: bf16[2,16,128], index: 1, kind: input, shape index: {}]   ;;  %s1563_s2 = inlined_call_operand.vmem [shape: bf16[16,16], index: 2, kind: input, shape index: {}]   ;;  %s1564_s3 = inlined_call_operand.vmem [shape: f32[16,1], index: 3, kind: input, shape index: {}]   ;;  %s1565_s4 = inlined_call_operand.vmem [shape: bf16[16,16], index: 4, kind: input, shape index: {}]   ;;  %s1566_s5 = inlined_call_operand.vmem [shape: f32[16,1], index: 5, kind: input, shape index: {}]   ;;  %s1567_s6 = inlined_call_operand.<no memory space> [shape: f32[1], index: 6, kind: input, shape index: {}]   ;;  %s1568_s7 = inlined_call_operand.hbm [shape: f32[2,16,128], index: 7, kind: output, shape index: {}]  }
   0x1   :  { %12 = sst [smem:[#allocation6]] %s1567_s6 }
   0x2   :  { %13 = vsyncpa [#allocation8], 0 }
   0x3   :  { %15 = vsyncpa [#allocation8 + $0x1], 0  ;;  %s1371_s26 = smov 0   ;;  %s1373_s27 = smov 0  }
   0x4   :  { %s1375_s28 = smov 0   ;;  %s1377_s29 = smov 0  }
   0x5   :  { %s1379_s30 = smov 0   ;;  %s1381_s8 = smov 0  }
   0x6 LB: > { %s1044_s6 = sadd.s32 4294967295, %s1319_s8   ;;  %s1045_s9 = sadd.s32 4294967294, %s1319_s8   ;;  %s1319_s8 = sphi %s1381_s8, %s21_s8   ;;  %s1315_s30 = sphi %s1379_s30, %s1575_s30   ;;  %s1311_s29 = sphi %s1377_s29, %s1574_s29   ;;  %s1307_s28 = sphi %s1375_s28, %s1573_s28   ;;  %s1303_s27 = sphi %s1373_s27, %s1572_s27   ;;  %s1299_s26 = sphi %s1371_s26, %s1571_s26  }
   0x7   : > { %s40_s10 = sadd.s32 1, %s1315_s30  ;;  %s210_s11 = sadd.s32 1, %s1307_s28 }
   0x8   : > { %p42_p0 = scmp.ge.s32.totalorder %s40_s10, 2  ;;  %p220_p1 = scmp.ne.s32.totalorder %s1307_s28, %s1303_s27 }
   0x9   : > { %p221_p2 = scmp.eq.s32.totalorder %s1044_s6, 1  ;;  %p226_p3 = scmp.ne.s32.totalorder %s1303_s27, %s1299_s26 }
   0xa   : > { %s1577_s10 = smov (%p42_p0, %s40_s10), 0  ;;  %p227_p5 = scmp.eq.s32.totalorder %s1045_s9, 1 }
   0xb   : > { %p1411_p4 = por %p221_p2, %p220_p1  ;;  %s205_s13 = ssub.s32 %s1315_s30, %s1577_s10 }
   0xc   : > { %p1048_p6 = scmp.ge.s32.totalorder %s1319_s8, 1  ;;  %p208_p7 = scmp.eq.s32.totalorder %s205_s13, 0 }
   0xd   : > { %p1418_p8 = por %p227_p5, %p226_p3  ;;  %p282_p9 = scmp.lt.s32.totalorder %s1319_s8, 3 }
   0xe   : > { %s1424_s15 = scalar_select %p208_p7, %s1307_s28, %s210_s11  }
   0xf   : > { %p283_p10 = pnand %p1048_p6, %p282_p9 }
  0x10   : > { %p325_p11 = scmp.lt.s32.totalorder (!%p283_p10), %s1311_s29, 1  ;;  %v1321_v0 = vmov (!%p283_p10), 0.0   ;;  %vm1322_vm0 = vmmov (!%p283_p10), 0   ;;  %v350_v1 = vld [vmem:[%s1564_s3] sm:$0xff] (!%p283_p10)  ;;  %v1323_v2 = vmov (!%p283_p10), 0   ;;  %v351_v3 = vld [vmem:[%s1564_s3 + $0x8] sm:$0xff] (!%p283_p10) }
  0x11   : > { %286 = sbr.rel (%p283_p10) target bundleno = 789 (0x315), region = 48  ;;  %1102 = vmatprep.subr.bf16.mxu0 (!%p283_p10), %v1321_v0  ;;  %421 = vst [vmem:[#allocation4] sm:$0x1] (!%p283_p10), %v1321_v0  ;;  %1104 = vmatprep.mubr.msk.bf16.mxu0 (!%p283_p10), %vm1322_vm0, %v1321_v0  ;;  %v1216_v5 = vld [vmem:[%s1563_s2] sm:$0xff] (!%p283_p10)   ;;  %vm373_vm1 = vcmask (!%p283_p10), 130048   ;;  %v778_v7 = vld [vmem:[%s1566_s5 + $0x8] sm:$0xff] (!%p283_p10) }
  0x12   : > { %1213 = vset.pattern.permute.xlu0 (!%p283_p10), %v1323_v2  ;;  %v1218_v8 = vld [vmem:[%s1565_s4] sm:$0xff] (!%p283_p10)   ;;  %v1324_v36 = vmov (!%p283_p10), -1e+30   ;;  %s922_s23 = sld [smem:[#allocation6]] (!%p283_p10)  ;;  %s322_s24 = sand.u32 (!%p283_p10), 1, %s1303_s27  }
  0x13   : > { %354 = vperm.xlu0 (!%p283_p10), %1213, %v350_v1   ;;  %v777_v9 = vld [vmem:[%s1566_s5] sm:$0xff] (!%p283_p10)  ;;  %420 = vst [vmem:[#allocation3] sm:$0x1] (!%p283_p10), %v1324_v36  ;;  %s1075_s6 = sshll.u32 (!%p283_p10), %s1311_s29, 8  ;;  %s1515_s17 = scalar_lea.sflag (!%p283_p10), [#allocation8], %s322_s24 }
  0x14   : > { %s1325_s18 = smov (!%p283_p10), [#allocation7]  }
  0x17   : > { %359 = vperm.xlu0 (!%p283_p10), %1213, %v351_v3   ;;  %v697_v3 = vlaneseq (!%p283_p10) }
  0x18   : > { %s326_s16 = scalar_select %p325_p11, %s1311_s29, 1 }
  0x1a   : > { %s1073_s19 = sshll.u32 %s326_s16, 3  ;;  %s1511_s16 = scalar_lea.hbm %s1568_s7, %s1075_s6 }
  0x1b   : > { %s1438_s22 = scalar_lea.vmem %s1561_s0, %s1073_s19  ;;  %s340_s25 = scalar_lea.vmem %s1562_s1, %s1073_s19  ;;  %786 = vperm.xlu0 %1213, %v778_v7  }
  0x1c   : > { %v1215_v4 = vld [vmem:[%s1438_s22] sm:$0xff]   ;;  %s1245_s19 = sshll.u32 %s1325_s18, 4  ;;  %s1246_s19 = int_to_ptr.vmem [resolvable:$false] %s1245_s19 }
  0x1d   : > { %1103 = vmatpush3.bf16.msra.mxu0 %v1215_v4  ;;  %v1217_v6 = vld [vmem:[%s340_s25] sm:$0xff]   ;;  %s1049_s25 = sshll.u32 %s322_s24, 4  ;;  %s1247_s20 = scalar_lea.vmem %s1246_s19, 512 }
  0x1e   : > { %1126 = vmatprep.subr.bf16.mxu0 %v1321_v0  ;;  %433 = vxpose.xlu1.c.b16.start.end [1/1] (short) %v1217_v6, 128  ;;  %s324_s9 = scalar_lea.vmem [#allocation7], %s1049_s25 }
  0x1f   : > { %s945_s11 = sshll.u32 %s324_s9, 4  ;;  %s1513_s11 = int_to_ptr.vmem [resolvable:$true] %s945_s11 }
  0x20   : > { %1105 = vmatmul.mubr.msk.bf16.vlgmr.msra.gmra.mrb[0].mxu0 %vm373_vm1, %v1216_v5  ;;  %s1241_s29 = scalar_lea.vmem %s1513_s11, 256  ;;  %p1248_p1 = scmp.lt.s32.totalorder %s1513_s11, %s1246_s19 }
  0x21   : > { %1127 = vmatpush3.bf16.msra.mxu0 %v1217_v6  ;;  %1128 = vmatprep.mubr.msk.bf16.mxu0 %vm1322_vm0, %v1321_v0  ;;  %p1242_p12 = scmp.ne.s32.totalorder %s1513_s11, %s1241_s29  ;;  %p1249_p2 = scmp.lt.s32.totalorder %s1247_s20, %s1241_s29 }
  0x22   : > { %1214 = vset.pattern.permute.xlu1 %v1323_v2 }
  0x23   : > { %p1243_p13 = pnand %p1242_p12, %p1411_p4  ;;  %p1250_p3 = por %p1249_p2, %p1248_p1 }
  0x25   : > { %p1244_p0 = pneg %p1243_p13 }
  0x27   : > { %p1251_p5 = pnand %p1250_p3, %p1244_p0 }
  0x28   : > { %1129 = vmatmul.mubr.msk.bf16.vlgmr.msra.gmra.mrb[4].mxu0 %vm373_vm1, %v1218_v8 }
  0x3e   : > { %781 = vperm.xlu1 %1214, %v777_v9  }
  0x84   : > { %v441_v10 = vpop.trf.xlu1 }
  0x85   : > { %1110 = vmatprep.mubr.msk.bf16.mxu1 %vm373_vm1, %v441_v10  ;;  %v698_v10 = vshrl.u32 %v697_v3, 7 }
  0x88   : > { %v442_v11 = vpop.trf.xlu1 }
  0x8c   : > { %v443_v12 = vpop.trf.xlu1 }
  0x90   : > { %v444_v13 = vpop.trf.xlu1 }
  0x92   : > { %v355_v17 = vpop.permute.xlu0 %354 }
  0x94   : > { %v445_v14 = vpop.trf.xlu1 }
  0x96   : > { %v360_v21 = vpop.permute.xlu0 %359 }
  0x98   : > { %v446_v15 = vpop.trf.xlu1 }
  0x9a   : > { %v787_v31 = vpop.permute.xlu0 %786 }
  0x9c   : > { %v447_v16 = vpop.trf.xlu1 }
  0xa0   : > { %v448_v19 = vpop.trf.xlu1 }
  0xbd   : > { %v782_v27 = vpop.permute.xlu1 %781 }
  0xf3   : > { %v411_v18 = vpop.f32.mrb[0].mxu0 }
  0xf4   : > { %v1106_v20 = vpop.f32.mrb[1].mxu0  ;;  %v412_v23 = vadd.f32 %v411_v18, %v355_v17 }
  0xf5   : > { %v414_v22 = vpop.f32.mrb[2].mxu0 }
  0xf6   : > { %v415_v24 = vadd.f32 %v414_v22, %v360_v21  ;;  %v1107_v25 = vpop.f32.mrb[3].mxu0 }
  0xf8   : > { %v418_v26 = vpack.c.bf16 %v415_v24, %v412_v23 }
  0xfa   : > { %1108 = vmatprep.subr.bf16.mxu1 %v418_v26 }
  0xfb   : > { %1109 = vmatpush3.bf16.msra.mxu1 %v418_v26  ;;  %v831_v28 = vpop.f32.mrb[4].mxu0 }
  0xfc   : > { %v1130_v29 = vpop.f32.mrb[5].mxu0  ;;  %v1465_v30 = vadd.f32 %v831_v28, %v782_v27  ;;  %1132 = vmatprep.subr.bf16.mxu1 %v1321_v0 }
  0xfd   : > { %v834_v32 = vpop.f32.mrb[6].mxu0 }
  0xfe   : > { %v1468_v33 = vadd.f32 %v834_v32, %v787_v31  ;;  %1111 = vmatmul.mubr.msk.bf16.vlgmr.msra.gmra.mrb[0].mxu1 %vm373_vm1, %v442_v11  ;;  %v1131_v34 = vpop.f32.mrb[7].mxu0 }
  0xff   : > { %1114 = vmatprep.mubr.msk.bf16.mxu1 %vm373_vm1, %v443_v12  ;;  %v1481_v12 = vld [vmem:[#allocation3] sm:$0x1] }
 0x100   : > { %v838_v35 = vpack.c.bf16 %v1468_v33, %v1465_v30  ;;  %v1077_v33 = vld [vmem:[%s1438_s22] sm:$0xff]  }
 0x106   : > { %1115 = vmatmul.mubr.msk.bf16.gmra.mrb[4].mxu1 %vm373_vm1, %v444_v13 }
 0x107   : > { %1118 = vmatprep.mubr.msk.bf16.mxu1 %vm373_vm1, %v445_v14  ;;  %v1483_v14 = vsub.s32 0, %v698_v10 }
 0x10e   : > { %1119 = vmatmul.mubr.msk.bf16.gmra.mrb[8].mxu1 %vm373_vm1, %v446_v15 }
 0x10f   : > { %1122 = vmatprep.mubr.msk.bf16.mxu1 %vm373_vm1, %v447_v16 }
 0x116   : > { %1123 = vmatmul.mubr.msk.bf16.gmra.mrb[12].mxu1 %vm373_vm1, %v448_v19 }
 0x117   : > { %1148 = vmatprep.mubr.msk.bf16.mxu1 %vm1322_vm0, %v1321_v0 }
 0x1d1   : > { %v1112_v37 = vpop.f32.mrb[0].mxu1 }
 0x1d2   : > { %v508_v38 = vpop.f32.mrb[1].mxu1 }
 0x1d3   : > { %v1113_v39 = vpop.f32.mrb[2].mxu1 }
 0x1d4   : > { %v511_v40 = vpop.f32.mrb[3].mxu1 }
 0x1d9   : > { %v1116_v41 = vpop.f32.mrb[4].mxu1 }
 0x1da   : > { %v673_v42 = vmax.f32 %v1112_v37, %v1116_v41  ;;  %v524_v43 = vpop.f32.mrb[5].mxu1 }
 0x1db   : > { %v671_v44 = vmax.f32 %v508_v38, %v524_v43  ;;  %v1117_v45 = vpop.f32.mrb[6].mxu1 }
 0x1dc   : > { %v677_v46 = vmax.f32 %v673_v42, -1e+30  ;;  %v674_v47 = vmax.f32 %v1113_v39, %v1117_v45  ;;  %v527_v48 = vpop.f32.mrb[7].mxu1 }
 0x1dd   : > { %v675_v49 = vmax.f32 %v671_v44, -1e+30  ;;  %v672_v50 = vmax.f32 %v511_v40, %v527_v48 }
 0x1de   : > { %v678_v51 = vmax.f32 %v674_v47, -1e+30  ;;  %v681_v53 = vmax.f32 %v677_v46, -1e+30 }
 0x1df   : > { %v676_v52 = vmax.f32 %v672_v50, -1e+30  ;;  %v679_v55 = vmax.f32 %v675_v49, -1e+30 }
 0x1e0   : > { %v682_v54 = vmax.f32 %v678_v51, -1e+30 }
 0x1e1   : > { %v680_v56 = vmax.f32 %v676_v52, -1e+30  ;;  %v1120_v57 = vpop.f32.mrb[8].mxu1 }
 0x1e2   : > { %v684_v58 = vmax.f32 %v681_v53, %v682_v54  ;;  %v540_v59 = vpop.f32.mrb[9].mxu1 }
 0x1e3   : > { %v683_v60 = vmax.f32 %v679_v55, %v680_v56  ;;  %v1121_v61 = vpop.f32.mrb[10].mxu1 }
 0x1e4   : > { %v543_v62 = vpop.f32.mrb[11].mxu1 }
 0x1e5   : > { %v685_v63 = vmax.f32 %v683_v60, %v684_v58 }
 0x1e7   : > { %v686_v1 = vrot.slane %v685_v63, 4 }
 0x1e9   : > { %v687_v2 = vmax.f32 %v685_v63, %v686_v1  ;;  %v1124_v4 = vpop.f32.mrb[12].mxu1 }
 0x1ea   : > { %v556_v5 = vpop.f32.mrb[13].mxu1 }
 0x1eb   : > { %v688_v6 = vrot.slane %v687_v2, 2  ;;  %v1125_v7 = vpop.f32.mrb[14].mxu1 }
 0x1ec   : > { %v559_v8 = vpop.f32.mrb[15].mxu1 }
 0x1ed   : > { %v689_v9 = vmax.f32 %v687_v2, %v688_v6 }
 0x1ef   : > { %v690_v11 = vrot.slane %v689_v9, 1 }
 0x1f1   : > { %v691_v13 = vmax.f32 %v689_v9, %v690_v11  ;;  %v750_v11 = vld [vmem:[#allocation4] sm:$0x1] }
 0x1f3   : > { %v1486_v15 = vmax.f32 %v1481_v12, %v691_v13 }
 0x1f5   : > { %v700_v16 = vrot.slane %v1486_v15, %v1483_v14  ;;  %902 = vst [vmem:[#allocation3] sm:$0x1] %v1486_v15  ;;  %v693_v62 = vsub.f32 %v1481_v12, %v1486_v15 }
 0x1f7   : > { %v702_v17 = vsub.f32 %v508_v38, %v700_v16  ;;  %v703_v18 = vsub.f32 %v511_v40, %v700_v16  ;;  %v704_v19 = vsub.f32 %v1112_v37, %v700_v16  ;;  %v705_v20 = vsub.f32 %v1113_v39, %v700_v16 }
 0x1f8   : > { %v706_v21 = vsub.f32 %v524_v43, %v700_v16  ;;  %v707_v22 = vsub.f32 %v527_v48, %v700_v16  ;;  %v708_v23 = vsub.f32 %v1116_v41, %v700_v16  ;;  %v709_v24 = vsub.f32 %v1117_v45, %v700_v16 }
 0x1f9   : > { %v718_v25 = vmul.f32 1.442695, %v702_v17  ;;  %v720_v26 = vmul.f32 1.442695, %v703_v18  ;;  %v722_v27 = vmul.f32 1.442695, %v704_v19 }
 0x1fa   : > { %v724_v28 = vmul.f32 1.442695, %v705_v20  ;;  %v726_v29 = vmul.f32 1.442695, %v706_v21  ;;  %v728_v31 = vmul.f32 1.442695, %v707_v22  ;;  %v923_v22 = vstv %s922_s23 }
 0x1fb   : > { %1219 = vpow2.f32 %v718_v25  ;;  %v730_v32 = vmul.f32 1.442695, %v708_v23  ;;  %v732_v34 = vmul.f32 1.442695, %v709_v24  ;;  %v710_v36 = vsub.f32 -1e+30, %v700_v16 }
 0x1fc   : > { %1221 = vpow2.f32 %v720_v26  ;;  %v694_v2 = vmul.f32 1.442695, %v693_v62  ;;  %v1078_v24 = vunpack.c.l.bf16 %v1077_v33 }
 0x1fd   : > { %1223 = vpow2.f32 %v722_v27  ;;  %v734_v39 = vmul.f32 1.442695, %v710_v36 }
 0x1fe   : > { %1225 = vpow2.f32 %v724_v28  ;;  %v1079_v28 = vunpack.c.h.bf16 %v1077_v33 }
 0x1ff   : > { %1227 = vpow2.f32 %v726_v29 }
 0x200   : > { %1229 = vpow2.f32 %v728_v31 }
 0x201   : > { %1231 = vpow2.f32 %v730_v32 }
 0x202   : > { %1233 = vpow2.f32 %v732_v34 }
 0x203   : > { %1235 = vpow2.f32 %v734_v39 }
 0x204   : > { %1237 = vpow2.f32 %v694_v2 }
 0x205   : > { %v1220_v37 = vpop.eup %1219 }
 0x206   : > { %v1222_v38 = vpop.eup %1221 }
 0x207   : > { %v1224_v40 = vpop.eup %1223  ;;  %v752_v41 = vadd.f32 %v1222_v38, %v1220_v37  ;;  %v849_v42 = vpack.c.bf16 %v1222_v38, %v1220_v37 }
 0x208   : > { %v1226_v43 = vpop.eup %1225 }
 0x209   : > { %v1228_v44 = vpop.eup %1227  ;;  %v753_v45 = vadd.f32 %v1224_v40, %v752_v41  ;;  %1133 = vmatpush3.bf16.msra.mxu1 %v849_v42  ;;  %v850_v46 = vpack.c.bf16 %v1226_v43, %v1224_v40 }
 0x20a   : > { %v1230_v47 = vpop.eup %1229  ;;  %1134 = vmatprep.subr.bf16.mxu1 %v1321_v0 }
 0x20b   : > { %v1232_v48 = vpop.eup %1231  ;;  %v754_v49 = vadd.f32 %v1226_v43, %v753_v45  ;;  %v851_v50 = vpack.c.bf16 %v1230_v47, %v1228_v44 }
 0x20c   : > { %v1234_v51 = vpop.eup %1233 }
 0x20d   : > { %v755_v52 = vadd.f32 %v1228_v44, %v754_v49  ;;  %1135 = vmatpush3.bf16.msra.mxu1 %v850_v46  ;;  %v852_v53 = vpack.c.bf16 %v1234_v51, %v1232_v48  ;;  %v1236_v57 = vpop.eup %1235 }
 0x20e   : > { %1136 = vmatprep.subr.bf16.mxu1 %v1321_v0  ;;  %v853_v60 = vpack.c.bf16 %v1236_v57, %v1236_v57  ;;  %v1238_v10 = vpop.eup %1237 }
 0x20f   : > { %v756_v54 = vadd.f32 %v1230_v47, %v755_v52  ;;  %v751_v13 = vmul.f32 %v1238_v10, %v750_v11  ;;  %v845_v17 = vrot.slane %v1238_v10, %v1483_v14 }
 0x211   : > { %v757_v55 = vadd.f32 %v1232_v48, %v756_v54  ;;  %1137 = vmatpush3.bf16.msra.mxu1 %v851_v50  ;;  %v847_v30 = vmul.f32 0.0, %v845_v17 }
 0x212   : > { %1138 = vmatprep.subr.bf16.mxu1 %v1321_v0 }
 0x213   : > { %v758_v56 = vadd.f32 %v1234_v51, %v757_v55 }
 0x215   : > { %v759_v58 = vadd.f32 %v1236_v57, %v758_v56  ;;  %1139 = vmatpush3.bf16.msra.mxu1 %v852_v53 }
 0x216   : > { %1140 = vmatprep.subr.bf16.mxu1 %v1321_v0 }
 0x217   : > { %v760_v59 = vadd.f32 %v1236_v57, %v759_v58 }
 0x219   : > { %v761_v61 = vadd.f32 %v1236_v57, %v760_v59  ;;  %1141 = vmatpush3.bf16.msra.mxu1 %v853_v60 }
 0x21a   : > { %1142 = vmatprep.subr.bf16.mxu1 %v1321_v0 }
 0x21b   : > { %v762_v63 = vadd.f32 %v1236_v57, %v761_v61 }
 0x21d   : > { %v763_v1 = vadd.f32 %v1236_v57, %v762_v63  ;;  %1143 = vmatpush3.bf16.msra.mxu1 %v853_v60 }
 0x21e   : > { %1144 = vmatprep.subr.bf16.mxu1 %v1321_v0 }
 0x21f   : > { %v764_v3 = vadd.f32 %v1236_v57, %v763_v1 }
 0x221   : > { %v765_v4 = vadd.f32 %v1236_v57, %v764_v3  ;;  %1145 = vmatpush3.bf16.msra.mxu1 %v853_v60 }
 0x222   : > { %1146 = vmatprep.subr.bf16.mxu1 %v1321_v0 }
 0x223   : > { %v766_v5 = vadd.f32 %v1236_v57, %v765_v4 }
 0x225   : > { %1147 = vmatpush3.bf16.msra.mxu1 %v853_v60  ;;  %v767_v6 = vrot.slane %v766_v5, 4 }
 0x227   : > { %v768_v7 = vadd.f32 %v767_v6, %v766_v5 }
 0x228   : > { %1149 = vmatmul.mubr.bf16.vlgmr.msra.gmra.mrb[16].mxu1 %v838_v35 }
 0x229   : > { %v769_v8 = vrot.slane %v768_v7, 2 }
 0x22b   : > { %v770_v9 = vadd.f32 %v769_v8, %v768_v7 }
 0x22d   : > { %v771_v12 = vrot.slane %v770_v9, 1 }
 0x22f   : > { %v772_v15 = vadd.f32 %v771_v12, %v770_v9 }
 0x231   : > { %v773_v16 = vadd.f32 %v772_v15, %v751_v13 }
 0x233   : > { %774 = vst [vmem:[#allocation4] sm:$0x1] %v773_v16 }
 0x23a   : > { %v906_v0 = vld [vmem:[#allocation4] sm:$0x1] }
 0x23b   : > { %1239 = vrcp.f32 %v906_v0 }
 0x245   : > { %v1240_v18 = vpop.eup %1239 }
 0x246   : > { %v914_v20 = vrot.slane %v1240_v18, %v1483_v14 }
 0x2fb   : > { %v891_v35 = vpop.f32.mrb[16].mxu1 }
 0x2fc   : > { %v898_v19 = vadd.f32 %v891_v35, %v847_v30  ;;  %v1150_v21 = vpop.f32.mrb[17].mxu1 }
 0x2fd   : > { %v894_v23 = vpop.f32.mrb[18].mxu1 }
 0x2fe   : > { %v916_v25 = vmul.f32 %v914_v20, %v898_v19  ;;  %v899_v26 = vadd.f32 %v894_v23, %v847_v30  ;;  %v1151_v27 = vpop.f32.mrb[19].mxu1 }
 0x300   : > { %v924_v29 = vmul.f32 %v923_v22, %v916_v25  ;;  %v917_v31 = vmul.f32 %v914_v20, %v899_v26 }
 0x302   : > { %v926_v32 = vadd.f32 %v1078_v24, %v924_v29  ;;  %v925_v34 = vmul.f32 %v923_v22, %v917_v31 }
 0x304   : > { %928 = vst [vmem:[%s324_s9] sm:$0xff] %v926_v32  ;;  %v927_v14 = vadd.f32 %v1079_v28, %v925_v34 }
 0x306   : > { %929 = vst [vmem:[%s324_s9 + $0x8] sm:$0xff] %v927_v14 }
 0x307   : > { %1254 = shalt.err (!%p1251_p5)
}
 0x308   : > { %s1255_s21 = scalar_lea.hbm %s1511_s16, 256  ;;  %s1259_s25 = scalar_lea.hbm %s1568_s7, 512 }
 0x309   : > { %p1256_p6 = scmp.ne.s32.totalorder %s1511_s16, %s1255_s21  ;;  %p1260_p10 = scmp.lt.u32.totalorder %s1511_s16, %s1568_s7 }
 0x30a   : > { %p1261_p11 = scmp.lt.u32.totalorder %s1259_s25, %s1255_s21  ;;  %p1263_p13 = scmp.lt.u32.totalorder %s1255_s21, %s1511_s16 }
 0x30b   : > { %p1257_p7 = pnand %p1256_p6, %p1411_p4 }
 0x30c   : > { %p1262_p12 = por %p1261_p11, %p1260_p10 }
 0x30d   : > { %p1258_p9 = pneg %p1257_p7 }
 0x30e   : > { %p1264_p0 = por %p1263_p13, %p1262_p12 }
 0x310   : > { %p1265_p1 = pnand %p1264_p0, %p1258_p9 }
 0x312   : > { %1268 = shalt.err (!%p1265_p1)
}
 0x313   : > { %s1326_s22 = smov 128   ;;  %s1327_s13 = smov 8  }
 0x314   : > { %1152 = dma.vmem_to_hbm [thread:$0]  (%p1411_p4), %s1513_s11, 256, %s1511_s16, %s1515_s17, %s1326_s22, %s1326_s22, %s1327_s13  }
 0x315 PF: > { %p1158_p2 = scmp.ge.s32.totalorder %s1319_s8, 2  ;;  %s960_s29 = sand.u32 1, %s1299_s26  }
 0x316   : > { %s961_s18 = scalar_lea.sflag [#allocation8], %s960_s29 }
 0x317   : > { %p1155_p3 = pnand %p1158_p2, %p1418_p8 }
 0x319   : > { %1294 = dma.done.wait (!%p1155_p3), %s961_s18, 256  }
 0x31a   : > { %1296 = vsyncadd (!%p1155_p3), %s961_s18, 4294967040  ;;  %s21_s8 = sadd.s32 1, %s1319_s8   ;;  %s1571_s26 = smov %s1303_s27 }
 0x31b   : > { %p18_p5 = scmp.ge.s32.totalorder %s21_s8, 4   ;;  %s1572_s27 = smov %s1307_s28 }
 0x31c   : > { %s1573_s28 = smov %s1424_s15  ;;  %s1574_s29 = smov %s1315_s30 }
 0x31d   : > { %s1575_s30 = smov %s1577_s10  ;;  %20 = sbr.rel (!%p18_p5) target bundleno = 6 (0x6), region = 94 }
 0x324   :  { %966 = vsyncpa [#allocation8], 1 }
 0x325   :  { %968 = vsyncpa [#allocation8 + $0x1], 1 }

</bundles_post_ra>
